<compile_context>
chip_gen: v5e
topology: v5e:2x2
jax: 0.10.0
libtpu: 0.0.40
codegen_flags: <defaults>
</compile_context>

<pallas_src>
import functools

import jax
import jax.numpy as jnp
from jax.experimental import pallas as pl
from jax.experimental.pallas import tpu as pltpu


def _round_up(x, m):
    return ((x + m - 1) // m) * m


# ---------------------------------------------------------------------------
# Pass 1: per-meta-path score sums + softmax over P.
# ---------------------------------------------------------------------------
def _score_softmax_kernel(x_ref, w_ref, b_ref, q_ref, attn_ref, acc_ref, *,
                          n_true):
    """Grid: (num_node_tiles,)  -- reduction axis ("arbitrary").

    x_ref    : (P, TN, F)  current node-tile for every meta-path
    w_ref    : (F, H)
    b_ref/q_ref : (1, H)
    attn_ref : (P, 1) f32  softmax attention weights (written on last step)
    acc_ref  : (P, H) f32  running per-meta-path column sums of h' * q
    """
    t = pl.program_id(0)
    num_t = pl.num_programs(0)
    P = acc_ref.shape[0]

    @pl.when(t == 0)
    def _init():
        acc_ref[...] = jnp.zeros_like(acc_ref)

    w = w_ref[...]
    b = b_ref[...].astype(jnp.float32)
    q = q_ref[...].astype(jnp.float32)

    # Keep h / h' in registers: matmul -> tanh -> q-reduce, never stored.
    for p in range(P):                       # P (meta-paths) is small & static
        h = jnp.dot(x_ref[p], w, preferred_element_type=jnp.float32)  # (TN,H)
        hp = jnp.tanh(h + b)
        part = jnp.sum(hp * q, axis=0, keepdims=True)                  # (1,H)
        acc_ref[pl.ds(p, 1), :] = acc_ref[pl.ds(p, 1), :] + part

    @pl.when(t == num_t - 1)
    def _finalize():
        # Mean over the TRUE node count.  Zero-padded rows add the same
        # constant logit to every meta-path, so the softmax is unaffected.
        s = jnp.sum(acc_ref[...], axis=1, keepdims=True) * (1.0 / n_true)
        m = jnp.max(s, axis=0, keepdims=True)
        e = jnp.exp(s - m)
        denom = jnp.sum(e, axis=0, keepdims=True)
        attn_ref[...] = e * pl.reciprocal(denom, approx=True)


def _score_pass(x3, W, b, q, n_true, tn):
    P, n_pad, F = x3.shape
    H = W.shape[1]
    num_t = n_pad // tn
    kernel = functools.partial(_score_softmax_kernel, n_true=n_true)
    return pl.pallas_call(
        kernel,
        out_shape=jax.ShapeDtypeStruct((P, 1), jnp.float32),
        grid=(num_t,),
        in_specs=[
            pl.BlockSpec((P, tn, F), lambda t: (0, t, 0)),
            pl.BlockSpec((F, H), lambda t: (0, 0)),
            pl.BlockSpec((1, H), lambda t: (0, 0)),
            pl.BlockSpec((1, H), lambda t: (0, 0)),
        ],
        out_specs=pl.BlockSpec((P, 1), lambda t: (0, 0)),
        scratch_shapes=[pltpu.VMEM((P, H), jnp.float32)],
        compiler_params=pltpu.CompilerParams(
            dimension_semantics=("arbitrary",),
            vmem_limit_bytes=32 * 1024 * 1024),
    )(x3, W, b, q)


# ---------------------------------------------------------------------------
# Pass 2: lane-dense weighted sum over meta-paths on the flattened (P, N*F) view.
# ---------------------------------------------------------------------------
def _combine_kernel(attn_ref, x_ref, o_ref):
    a = attn_ref[...]                                    # (P, 1) f32
    x = x_ref[...].astype(jnp.float32)                   # (P, TL)
    o_ref[...] = jnp.sum(a * x, axis=0, keepdims=True).astype(o_ref.dtype)


def _combine_pass(attn, x2, tl):
    P, l_pad = x2.shape
    num_l = l_pad // tl
    return pl.pallas_call(
        _combine_kernel,
        out_shape=jax.ShapeDtypeStruct((1, l_pad), x2.dtype),
        grid=(num_l,),
        in_specs=[
            pl.BlockSpec((P, 1), lambda i: (0, 0)),
            pl.BlockSpec((P, tl), lambda i: (0, i)),
        ],
        out_specs=pl.BlockSpec((1, tl), lambda i: (0, i)),
        compiler_params=pltpu.CompilerParams(
            dimension_semantics=("parallel",),        # megacore split on v7x
            vmem_limit_bytes=32 * 1024 * 1024),
    )(attn, x2)


# ---------------------------------------------------------------------------
# Wrapper (reshape / pad / tile-size selection, all outside the kernels).
# ---------------------------------------------------------------------------
def semantic_attention_layer(inputs, W, b, q, P):
    """inputs: (P*N, out_ft); W: (out_ft, hid); b, q: (1, hid) -> (N, out_ft)."""
    PN, F = inputs.shape
    assert PN % P == 0
    N = PN // P
    itemsize = jnp.dtype(inputs.dtype).itemsize

    # ---- Pass 1: attention weights over meta-paths ------------------------
    sub = 16 if itemsize <= 2 else 8          # sublane packing of the dtype
    tn = min(512, _round_up(N, sub))          # large node tiles when N allows
    # keep the (double-buffered) x tile comfortably inside scoped VMEM
    while tn > sub and P * tn * F * itemsize > 4 * 1024 * 1024:
        tn -= sub
    n_pad = _round_up(N, tn)
    x3 = inputs.reshape(P, N, F)
    if n_pad != N:
        x3 = jnp.pad(x3, ((0, 0), (0, n_pad - N), (0, 0)))
    attn = _score_pass(x3, W, b, q, N, tn)                # (P, 1) f32

    # ---- Pass 2: weighted sum, lane-dense flattened layout ----------------
    L = N * F
    tl = min(32768, _round_up(L, 128))        # lane tile: multiple of 128
    while tl > 128 and P * tl * itemsize > 4 * 1024 * 1024:
        tl -= 128
    l_pad = _round_up(L, tl)
    x2 = inputs.reshape(P, L)
    if l_pad != L:
        x2 = jnp.pad(x2, ((0, 0), (0, l_pad - L)))
    out_flat = _combine_pass(attn, x2, tl)                # (1, l_pad)
    return out_flat[0, :L].reshape(N, F)


# ---------------------------------------------------------------------------
# Reference + demo
# ---------------------------------------------------------------------------
def _xavier_uniform(key, shape, gain):
    fan_in, fan_out = shape[0], shape[1]
    bound = gain * jnp.sqrt(6.0 / (fan_in + fan_out))
    return jax.random.uniform(key, shape, jnp.float32, -bound, bound)


def _reference(inputs, W, b, q, P):
    """Pure-JAX reference of the PyTorch forward (for correctness check)."""
    h = inputs @ W
    h_prime = jnp.tanh(h + b)
    s = (h_prime @ q.T).reshape(P, -1)               # (P, N)
    N = s.shape[1]
    s = jnp.mean(s, axis=1, keepdims=True)           # (P, 1)
    attn = jax.nn.softmax(s, axis=0).reshape(P, 1, 1)
    x3 = inputs.reshape(P, N, inputs.shape[-1])
    return jnp.sum(x3 * attn, axis=0)


if __name__ == "__main__":
    # Small, forward-consistent shapes: P meta-paths, N nodes, out_ft features.
    P, N = 4, 8
    out_ft, hid_ft = 16, 32

    key = jax.random.PRNGKey(0)
    k_x, k_w, k_b, k_q = jax.random.split(key, 4)

    inputs = jax.random.normal(k_x, (P * N, out_ft), jnp.float32)
    gain = 1.414
    W = _xavier_uniform(k_w, (out_ft, hid_ft), gain)
    b = _xavier_uniform(k_b, (1, hid_ft), gain)
    q = _xavier_uniform(k_q, (1, hid_ft), gain)

    out = semantic_attention_layer(inputs, W, b, q, P)
    out = jax.block_until_ready(out)

    ref = _reference(inputs, W, b, q, P)
    assert out.shape == (N, out_ft)
    # Tolerance covers the EUP approx-reciprocal in the softmax denominator.
    assert jnp.allclose(out, ref, atol=1e-3, rtol=1e-3), "mismatch vs reference"

    print("KERNEL_OK")
</pallas_src>

<mosaic_0001>
module attributes {stable_mosaic.version = 11 : i64} {
  func.func @_score_softmax_kernel(%arg0: i32, %arg1: memref<4x8x16xf32, #tpu.memory_space<vmem>>, %arg2: memref<16x32xf32, #tpu.memory_space<vmem>>, %arg3: memref<1x32xf32, #tpu.memory_space<vmem>>, %arg4: memref<1x32xf32, #tpu.memory_space<vmem>>, %arg5: memref<4x1xf32, #tpu.memory_space<vmem>>, %arg6: memref<4x32xf32, #tpu.memory_space<vmem>>) attributes {dimension_semantics = [#tpu.dimension_semantics<arbitrary>], iteration_bounds = array<i64: 1>, scalar_prefetch = 0 : i64, scratch_operands = 1 : i64, tpu.core_type = #tpu.core_type<tc>, window_params = [{transform_indices = @transform_0, window_bounds = array<i64: 4, 8, 16>}, {pipeline_mode = #tpu.pipeline_mode<synchronous>, transform_indices = @transform_1, window_bounds = array<i64: 16, 32>}, {pipeline_mode = #tpu.pipeline_mode<synchronous>, transform_indices = @transform_2, window_bounds = array<i64: 1, 32>}, {pipeline_mode = #tpu.pipeline_mode<synchronous>, transform_indices = @transform_3, window_bounds = array<i64: 1, 32>}, {pipeline_mode = #tpu.pipeline_mode<synchronous>, transform_indices = @transform_4, window_bounds = array<i64: 4, 1>}]} {
    %c0_i32 = arith.constant 0 : i32
    %0 = arith.cmpi eq, %arg0, %c0_i32 : i32
    %1 = arith.extui %0 : i1 to i32
    %c0_i32_0 = arith.constant 0 : i32
    %2 = arith.cmpi ne, %1, %c0_i32_0 : i32
    scf.if %2 {
      %cst_40 = arith.constant 0.000000e+00 : f32
      %61 = vector.broadcast %cst_40 : f32 to vector<4x32xf32>
      %c0_41 = arith.constant 0 : index
      %c0_42 = arith.constant 0 : index
      %62 = vector.load %arg6[%c0_41, %c0_42] : memref<4x32xf32, #tpu.memory_space<vmem>>, vector<4x32xf32>
      tpu.vector_store %arg6[%c0_41, %c0_42], %61 {strides = array<i32>} : memref<4x32xf32, #tpu.memory_space<vmem>>, vector<4x32xf32>,
    } else {
    }
    %c0 = arith.constant 0 : index
    %c0_1 = arith.constant 0 : index
    %3 = vector.load %arg2[%c0, %c0_1] : memref<16x32xf32, #tpu.memory_space<vmem>>, vector<16x32xf32>
    %c0_2 = arith.constant 0 : index
    %c0_3 = arith.constant 0 : index
    %4 = vector.load %arg3[%c0_2, %c0_3] : memref<1x32xf32, #tpu.memory_space<vmem>>, vector<1x32xf32>
    %c0_4 = arith.constant 0 : index
    %c0_5 = arith.constant 0 : index
    %5 = vector.load %arg4[%c0_4, %c0_5] : memref<1x32xf32, #tpu.memory_space<vmem>>, vector<1x32xf32>
    %c0_6 = arith.constant 0 : index
    %c0_7 = arith.constant 0 : index
    %c0_8 = arith.constant 0 : index
    %6 = vector.load %arg1[%c0_6, %c0_7, %c0_8] : memref<4x8x16xf32, #tpu.memory_space<vmem>>, vector<1x8x16xf32>
    %7 = vector.shape_cast %6 : vector<1x8x16xf32> to vector<8x16xf32>
    %cst = arith.constant dense<0.000000e+00> : vector<8x32xf32>
    %8 = tpu.matmul %7, %3, %cst {dimension_numbers = #tpu.dot_dimension_numbers<[1], [0], [0], [1], [0, 0, 1, 1], [], []>} : vector<8x16xf32>, vector<16x32xf32>, vector<8x32xf32> -> vector<8x32xf32>
    %9 = vector.broadcast %4 : vector<1x32xf32> to vector<8x32xf32>
    %10 = arith.addf %8, %9 : vector<8x32xf32>
    %11 = math.tanh %10 : vector<8x32xf32>
    %12 = vector.broadcast %5 : vector<1x32xf32> to vector<8x32xf32>
    %13 = arith.mulf %11, %12 : vector<8x32xf32>
    %cst_9 = arith.constant dense<0.000000e+00> : vector<32xf32>
    %14 = vector.multi_reduction <add>, %13, %cst_9 [0] : vector<8x32xf32> to vector<32xf32>
    %15 = vector.shape_cast %14 : vector<32xf32> to vector<1x32xf32>
    %c0_10 = arith.constant 0 : index
    %c0_11 = arith.constant 0 : index
    %16 = vector.load %arg6[%c0_10, %c0_11] : memref<4x32xf32, #tpu.memory_space<vmem>>, vector<1x32xf32>
    %17 = arith.addf %16, %15 : vector<1x32xf32>
    %c0_12 = arith.constant 0 : index
    %c0_13 = arith.constant 0 : index
    %18 = vector.load %arg6[%c0_12, %c0_13] : memref<4x32xf32, #tpu.memory_space<vmem>>, vector<1x32xf32>
    tpu.vector_store %arg6[%c0_12, %c0_13], %17 {strides = array<i32>} : memref<4x32xf32, #tpu.memory_space<vmem>>, vector<1x32xf32>,
    %c1 = arith.constant 1 : index
    %c0_14 = arith.constant 0 : index
    %c0_15 = arith.constant 0 : index
    %19 = vector.load %arg1[%c1, %c0_14, %c0_15] : memref<4x8x16xf32, #tpu.memory_space<vmem>>, vector<1x8x16xf32>
    %20 = vector.shape_cast %19 : vector<1x8x16xf32> to vector<8x16xf32>
    %cst_16 = arith.constant dense<0.000000e+00> : vector<8x32xf32>
    %21 = tpu.matmul %20, %3, %cst_16 {dimension_numbers = #tpu.dot_dimension_numbers<[1], [0], [0], [1], [0, 0, 1, 1], [], []>} : vector<8x16xf32>, vector<16x32xf32>, vector<8x32xf32> -> vector<8x32xf32>
    %22 = vector.broadcast %4 : vector<1x32xf32> to vector<8x32xf32>
    %23 = arith.addf %21, %22 : vector<8x32xf32>
    %24 = math.tanh %23 : vector<8x32xf32>
    %25 = vector.broadcast %5 : vector<1x32xf32> to vector<8x32xf32>
    %26 = arith.mulf %24, %25 : vector<8x32xf32>
    %cst_17 = arith.constant dense<0.000000e+00> : vector<32xf32>
    %27 = vector.multi_reduction <add>, %26, %cst_17 [0] : vector<8x32xf32> to vector<32xf32>
    %28 = vector.shape_cast %27 : vector<32xf32> to vector<1x32xf32>
    %c1_18 = arith.constant 1 : index
    %c0_19 = arith.constant 0 : index
    %29 = vector.load %arg6[%c1_18, %c0_19] : memref<4x32xf32, #tpu.memory_space<vmem>>, vector<1x32xf32>
    %30 = arith.addf %29, %28 : vector<1x32xf32>
    %c1_20 = arith.constant 1 : index
    %c0_21 = arith.constant 0 : index
    %31 = vector.load %arg6[%c1_20, %c0_21] : memref<4x32xf32, #tpu.memory_space<vmem>>, vector<1x32xf32>
    tpu.vector_store %arg6[%c1_20, %c0_21], %30 {strides = array<i32>} : memref<4x32xf32, #tpu.memory_space<vmem>>, vector<1x32xf32>,
    %c2 = arith.constant 2 : index
    %c0_22 = arith.constant 0 : index
    %c0_23 = arith.constant 0 : index
    %32 = vector.load %arg1[%c2, %c0_22, %c0_23] : memref<4x8x16xf32, #tpu.memory_space<vmem>>, vector<1x8x16xf32>
    %33 = vector.shape_cast %32 : vector<1x8x16xf32> to vector<8x16xf32>
    %cst_24 = arith.constant dense<0.000000e+00> : vector<8x32xf32>
    %34 = tpu.matmul %33, %3, %cst_24 {dimension_numbers = #tpu.dot_dimension_numbers<[1], [0], [0], [1], [0, 0, 1, 1], [], []>} : vector<8x16xf32>, vector<16x32xf32>, vector<8x32xf32> -> vector<8x32xf32>
    %35 = vector.broadcast %4 : vector<1x32xf32> to vector<8x32xf32>
    %36 = arith.addf %34, %35 : vector<8x32xf32>
    %37 = math.tanh %36 : vector<8x32xf32>
    %38 = vector.broadcast %5 : vector<1x32xf32> to vector<8x32xf32>
    %39 = arith.mulf %37, %38 : vector<8x32xf32>
    %cst_25 = arith.constant dense<0.000000e+00> : vector<32xf32>
    %40 = vector.multi_reduction <add>, %39, %cst_25 [0] : vector<8x32xf32> to vector<32xf32>
    %41 = vector.shape_cast %40 : vector<32xf32> to vector<1x32xf32>
    %c2_26 = arith.constant 2 : index
    %c0_27 = arith.constant 0 : index
    %42 = vector.load %arg6[%c2_26, %c0_27] : memref<4x32xf32, #tpu.memory_space<vmem>>, vector<1x32xf32>
    %43 = arith.addf %42, %41 : vector<1x32xf32>
    %c2_28 = arith.constant 2 : index
    %c0_29 = arith.constant 0 : index
    %44 = vector.load %arg6[%c2_28, %c0_29] : memref<4x32xf32, #tpu.memory_space<vmem>>, vector<1x32xf32>
    tpu.vector_store %arg6[%c2_28, %c0_29], %43 {strides = array<i32>} : memref<4x32xf32, #tpu.memory_space<vmem>>, vector<1x32xf32>,
    %c3 = arith.constant 3 : index
    %c0_30 = arith.constant 0 : index
    %c0_31 = arith.constant 0 : index
    %45 = vector.load %arg1[%c3, %c0_30, %c0_31] : memref<4x8x16xf32, #tpu.memory_space<vmem>>, vector<1x8x16xf32>
    %46 = vector.shape_cast %45 : vector<1x8x16xf32> to vector<8x16xf32>
    %cst_32 = arith.constant dense<0.000000e+00> : vector<8x32xf32>
    %47 = tpu.matmul %46, %3, %cst_32 {dimension_numbers = #tpu.dot_dimension_numbers<[1], [0], [0], [1], [0, 0, 1, 1], [], []>} : vector<8x16xf32>, vector<16x32xf32>, vector<8x32xf32> -> vector<8x32xf32>
    %48 = vector.broadcast %4 : vector<1x32xf32> to vector<8x32xf32>
    %49 = arith.addf %47, %48 : vector<8x32xf32>
    %50 = math.tanh %49 : vector<8x32xf32>
    %51 = vector.broadcast %5 : vector<1x32xf32> to vector<8x32xf32>
    %52 = arith.mulf %50, %51 : vector<8x32xf32>
    %cst_33 = arith.constant dense<0.000000e+00> : vector<32xf32>
    %53 = vector.multi_reduction <add>, %52, %cst_33 [0] : vector<8x32xf32> to vector<32xf32>
    %54 = vector.shape_cast %53 : vector<32xf32> to vector<1x32xf32>
    %c3_34 = arith.constant 3 : index
    %c0_35 = arith.constant 0 : index
    %55 = vector.load %arg6[%c3_34, %c0_35] : memref<4x32xf32, #tpu.memory_space<vmem>>, vector<1x32xf32>
    %56 = arith.addf %55, %54 : vector<1x32xf32>
    %c3_36 = arith.constant 3 : index
    %c0_37 = arith.constant 0 : index
    %57 = vector.load %arg6[%c3_36, %c0_37] : memref<4x32xf32, #tpu.memory_space<vmem>>, vector<1x32xf32>
    tpu.vector_store %arg6[%c3_36, %c0_37], %56 {strides = array<i32>} : memref<4x32xf32, #tpu.memory_space<vmem>>, vector<1x32xf32>,
    %c0_i32_38 = arith.constant 0 : i32
    %58 = arith.cmpi eq, %arg0, %c0_i32_38 : i32
    %59 = arith.extui %58 : i1 to i32
    %c0_i32_39 = arith.constant 0 : i32
    %60 = arith.cmpi ne, %59, %c0_i32_39 : i32
    scf.if %60 {
      %c0_40 = arith.constant 0 : index
      %c0_41 = arith.constant 0 : index
      %61 = vector.load %arg6[%c0_40, %c0_41] : memref<4x32xf32, #tpu.memory_space<vmem>>, vector<4x32xf32>
      %cst_42 = arith.constant dense<0.000000e+00> : vector<4xf32>
      %62 = vector.multi_reduction <add>, %61, %cst_42 [1] : vector<4x32xf32> to vector<4xf32>
      %63 = vector.shape_cast %62 : vector<4xf32> to vector<4x1xf32>
      %cst_43 = arith.constant 1.250000e-01 : f32
      %64 = vector.broadcast %cst_43 : f32 to vector<4x1xf32>
      %65 = arith.mulf %63, %64 : vector<4x1xf32>
      %cst_44 = arith.constant dense<0xFF800000> : vector<1xf32>
      %66 = vector.multi_reduction <maximumf>, %65, %cst_44 [0] : vector<4x1xf32> to vector<1xf32>
      %67 = vector.shape_cast %66 : vector<1xf32> to vector<1x1xf32>
      %68 = vector.broadcast %67 : vector<1x1xf32> to vector<4x1xf32>
      %69 = arith.subf %65, %68 : vector<4x1xf32>
      %70 = math.exp %69 : vector<4x1xf32>
      %cst_45 = arith.constant dense<0.000000e+00> : vector<1xf32>
      %71 = vector.multi_reduction <add>, %70, %cst_45 [0] : vector<4x1xf32> to vector<1xf32>
      %72 = vector.shape_cast %71 : vector<1xf32> to vector<1x1xf32>
      %73 = tpu.reciprocal %72 {approx = true} : vector<1x1xf32> -> vector<1x1xf32>
      %74 = vector.broadcast %73 : vector<1x1xf32> to vector<4x1xf32>
      %75 = arith.mulf %70, %74 : vector<4x1xf32>
      %c0_46 = arith.constant 0 : index
      %c0_47 = arith.constant 0 : index
      %76 = vector.load %arg5[%c0_46, %c0_47] : memref<4x1xf32, #tpu.memory_space<vmem>>, vector<4x1xf32>
      tpu.vector_store %arg5[%c0_46, %c0_47], %75 {strides = array<i32>} : memref<4x1xf32, #tpu.memory_space<vmem>>, vector<4x1xf32>,
    } else {
    }
    return
  }
  func.func @transform_0(%arg0: i32) -> (i32, i32, i32) {
    %c0_i32 = arith.constant 0 : i32
    %c0_i32_0 = arith.constant 0 : i32
    %c0_i32_1 = arith.constant 0 : i32
    return %c0_i32, %arg0, %c0_i32_0 : i32, i32, i32
  }
  func.func @transform_1(%arg0: i32) -> (i32, i32) {
    %c0_i32 = arith.constant 0 : i32
    %c0_i32_0 = arith.constant 0 : i32
    %c0_i32_1 = arith.constant 0 : i32
    return %c0_i32, %c0_i32_0 : i32, i32
  }
  func.func @transform_2(%arg0: i32) -> (i32, i32) {
    %c0_i32 = arith.constant 0 : i32
    %c0_i32_0 = arith.constant 0 : i32
    %c0_i32_1 = arith.constant 0 : i32
    return %c0_i32, %c0_i32_0 : i32, i32
  }
  func.func @transform_3(%arg0: i32) -> (i32, i32) {
    %c0_i32 = arith.constant 0 : i32
    %c0_i32_0 = arith.constant 0 : i32
    %c0_i32_1 = arith.constant 0 : i32
    return %c0_i32, %c0_i32_0 : i32, i32
  }
  func.func @transform_4(%arg0: i32) -> (i32, i32) {
    %c0_i32 = arith.constant 0 : i32
    %c0_i32_0 = arith.constant 0 : i32
    %c0_i32_1 = arith.constant 0 : i32
    return %c0_i32, %c0_i32_0 : i32, i32
  }
}

</mosaic_0001>

<bundles_post_ra>
// kernel: tpu_custom_call.1
= control target key start
LH: loop header
LB: loop body
LE: loop exit
PB: predicated region body
PF: predicated region fallthrough
CT: control target
= control target key end

     0   :  { %9 = vsyncpa [#allocation4], 0  ;;  %s382_s0 = inlined_call_operand.hbm [shape: f32[4,8,16], index: 0, kind: input, shape index: {}]   ;;  %s383_s1 = inlined_call_operand.hbm [shape: f32[16,32], index: 1, kind: input, shape index: {}]   ;;  %s384_s2 = inlined_call_operand.vmem [shape: f32[1,32], index: 2, kind: input, shape index: {}]   ;;  %s385_s3 = inlined_call_operand.vmem [shape: f32[1,32], index: 3, kind: input, shape index: {}]   ;;  %s386_s4 = inlined_call_operand.vmem [shape: f32[4,1], index: 4, kind: output, shape index: {}]  }
   0x1   :  { %s15_s17 = sshll.u32 %s382_s0, 4  ;;  %s16_s17 = int_to_ptr.hbm [resolvable:$true] %s15_s17 }
   0x2   :  { %10 = vsyncpa [#allocation6], 0  ;;  %s327_s18 = smov [#allocation3]   ;;  %s28_s22 = sshll.u32 %s383_s1, 4  ;;  %s29_s22 = int_to_ptr.hbm [resolvable:$true] %s28_s22 }
   0x3   :  { %s17_s19 = sshll.u32 %s327_s18, 4  ;;  %s328_s23 = smov 128   ;;  %s18_s19 = int_to_ptr.vmem [resolvable:$true] %s17_s19 }
   0x4   :  { %s329_s24 = smov 8   ;;  %s330_s25 = smov [#allocation5]  }
   0x5   :  { %23 = dma.hbm_to_vmem [thread:$0]  %s16_s17, 512, %s18_s19, [#allocation4], %s328_s23, %s328_s23, %s329_s24  }
   0x6   :  { %s30_s26 = sshll.u32 %s330_s25, 4  ;;  %s31_s26 = int_to_ptr.vmem [resolvable:$true] %s30_s26 }
   0x7   :  { %36 = dma.hbm_to_vmem [thread:$0]  %s29_s22, 256, %s31_s26, [#allocation6], %s328_s23, %s328_s23, %s329_s24  }
   0x8   :  { %323 = dma.done.wait [#allocation4], 512  }
   0x9   :  { %324 = vsyncadd [#allocation4], 4294966784 }
   0xa   :  { %325 = dma.done.wait [#allocation6], 256  }
   0xb   :  { %326 = vsyncadd [#allocation6], 4294967040  ;;  %v56_v0 = vld [vmem:[#allocation5 + $0x8] sm:$0xff]  ;;  %v55_v1 = vld [vmem:[#allocation5] sm:$0xff]  ;;  %vm63_vm0 = vcmask 130048   ;;  %vm53_vm1 = vcmask 257024  }
   0xc   :  { %81 = vmatpush.msra.mxu0 %v56_v0  ;;  %123 = vmatpush.msra.mxu1 %v56_v0  ;;  %v59_v2 = vld [vmem:[#allocation3] sm:$0xff]  ;;  %v105_v3 = vld [vmem:[#allocation3 + $0x8] sm:$0xff]  ;;  %v142_v4 = vld [vmem:[#allocation3 + $0x10] sm:$0xff]  ;;  %v331_v6 = vmov 0.0   ;;  %vm92_vm2 = vcmask 261120   ;;  %vm102_vm3 = vcmask 253952  }
   0xd   :  { %160 = vmatpush.msra.mxu2 %v56_v0  ;;  %197 = vmatpush.msra.mxu3 %v56_v0  ;;  %v179_v5 = vld [vmem:[#allocation3 + $0x18] sm:$0xff]  ;;  %54 = vst.msk [vmem:[#allocation2] sm:$0xf] %vm53_vm1, %v331_v6  ;;  %vm224_vm4 = vcmask 1043456   ;;  %vm244_vm5 = vcmask 3072  }
   0xe   :  { %82 = vmatpush.msra.mxu0 %v55_v1  ;;  %124 = vmatpush.msra.mxu1 %v55_v1  ;;  %v261_v7 = vld [vmem:[%s384_s2] ss:$0 sm:$0xff] }
   0xf   :  { %161 = vmatpush.msra.mxu2 %v55_v1  ;;  %198 = vmatpush.msra.mxu3 %v55_v1  ;;  %v262_v12 = vld [vmem:[%s385_s3] ss:$0 sm:$0xff] }
  0x10   :  { %252 = vmatmul.msk.f32.vlgmr.msra.gmra.mxu0 %vm63_vm0, %v59_v2  ;;  %253 = vmatmul.msk.f32.vlgmr.msra.gmra.mxu1 %vm63_vm0, %v105_v3 }
  0x11   :  { %254 = vmatmul.msk.f32.vlgmr.msra.gmra.mxu2 %vm63_vm0, %v142_v4  ;;  %255 = vmatmul.msk.f32.vlgmr.msra.gmra.mxu3 %vm63_vm0, %v179_v5 }
  0x14   :  { %v100_v42 = vld [vmem:[#allocation2] sm:$0x1]  ;;  %v138_v45 = vld [vmem:[#allocation2 + $0x1] sm:$0x1]  ;;  %v175_v55 = vld [vmem:[#allocation2 + $0x2] sm:$0x1] }
  0x15   :  { %v212_v57 = vld [vmem:[#allocation2 + $0x3] sm:$0x1] }
  0x8d   :  { %v84_v8 = vpop.f32.mrf.mxu0  ;;  %v126_v9 = vpop.f32.mrf.mxu1 }
  0x8e   :  { %v85_v10 = vadd.f32 %v261_v7, %v84_v8  ;;  %v127_v11 = vadd.f32 %v261_v7, %v126_v9 }
  0x90   :  { %263 = vtanh.f32 %v85_v10 }
  0x91   :  { %265 = vtanh.f32 %v127_v11 }
  0x94   :  { %v163_v13 = vpop.f32.mrf.mxu2  ;;  %v200_v14 = vpop.f32.mrf.mxu3 }
  0x95   :  { %v164_v15 = vadd.f32 %v261_v7, %v163_v13  ;;  %v201_v16 = vadd.f32 %v261_v7, %v200_v14 }
  0x96   :  { %v264_v17 = vpop.eup %263 }
  0x97   :  { %v266_v18 = vpop.eup %265  ;;  %v91_v19 = vmul.f32 %v264_v17, %v262_v12  ;;  %267 = vtanh.f32 %v164_v15 }
  0x98   :  { %v130_v20 = vmul.f32 %v266_v18, %v262_v12  ;;  %269 = vtanh.f32 %v201_v16 }
  0x99   :  { %v93_v21 = vsel %vm92_vm2, %v91_v19, 0.0 }
  0x9a   :  { %v94_v22 = vrot.slane %v93_v21, 4  ;;  %v131_v23 = vsel %vm92_vm2, %v130_v20, 0.0 }
  0x9b   :  { %v132_v24 = vrot.slane %v131_v23, 4 }
  0x9c   :  { %v95_v25 = vadd.f32 %v94_v22, %v93_v21 }
  0x9d   :  { %v268_v26 = vpop.eup %267  ;;  %v133_v27 = vadd.f32 %v132_v24, %v131_v23 }
  0x9e   :  { %v270_v28 = vpop.eup %269  ;;  %v96_v29 = vrot.slane %v95_v25, 2  ;;  %v167_v30 = vmul.f32 %v268_v26, %v262_v12 }
  0x9f   :  { %v134_v31 = vrot.slane %v133_v27, 2  ;;  %v204_v32 = vmul.f32 %v270_v28, %v262_v12 }
  0xa0   :  { %v97_v33 = vadd.f32 %v96_v29, %v95_v25  ;;  %v168_v34 = vsel %vm92_vm2, %v167_v30, 0.0 }
  0xa1   :  { %v135_v35 = vadd.f32 %v134_v31, %v133_v27  ;;  %v169_v36 = vrot.slane %v168_v34, 4  ;;  %v205_v37 = vsel %vm92_vm2, %v204_v32, 0.0 }
  0xa2   :  { %v98_v38 = vrot.slane %v97_v33, 1  ;;  %v206_v39 = vrot.slane %v205_v37, 4 }
  0xa3   :  { %v136_v40 = vrot.slane %v135_v35, 1  ;;  %v170_v41 = vadd.f32 %v169_v36, %v168_v34 }
  0xa4   :  { %v99_v43 = vadd.f32 %v98_v38, %v97_v33  ;;  %v207_v44 = vadd.f32 %v206_v39, %v205_v37 }
  0xa5   :  { %v137_v46 = vadd.f32 %v136_v40, %v135_v35  ;;  %v171_v47 = vrot.slane %v170_v41, 2 }
  0xa6   :  { %v208_v48 = vrot.slane %v207_v44, 2  ;;  %v101_v49 = vadd.f32 %v100_v42, %v99_v43 }
  0xa7   :  { %v172_v50 = vadd.f32 %v171_v47, %v170_v41  ;;  %v139_v51 = vadd.f32 %v138_v45, %v137_v46 }
  0xa8   :  { %v209_v52 = vadd.f32 %v208_v48, %v207_v44  ;;  %103 = vst.msk [vmem:[#allocation2] sm:$0x1] %vm102_vm3, %v101_v49 }
  0xa9   :  { %v173_v53 = vrot.slane %v172_v50, 1  ;;  %140 = vst.msk [vmem:[#allocation2 + $0x1] sm:$0x1] %vm102_vm3, %v139_v51 }
  0xaa   :  { %v210_v54 = vrot.slane %v209_v52, 1 }
  0xab   :  { %v174_v56 = vadd.f32 %v173_v53, %v172_v50 }
  0xac   :  { %v211_v58 = vadd.f32 %v210_v54, %v209_v52 }
  0xad   :  { %v176_v59 = vadd.f32 %v175_v55, %v174_v56 }
  0xae   :  { %v213_v60 = vadd.f32 %v212_v57, %v211_v58 }
  0xaf   :  { %177 = vst.msk [vmem:[#allocation2 + $0x2] sm:$0x1] %vm102_vm3, %v176_v59 }
  0xb0   :  { %214 = vst.msk [vmem:[#allocation2 + $0x3] sm:$0x1] %vm102_vm3, %v213_v60 }
  0xb7   :  { %v218_v61 = vld [vmem:[#allocation2] sm:$0xf] }
  0xb8   :  { %v220_v62 = vsel %vm53_vm1, %v218_v61, 0.0 }
  0xb9   :  { %221 = vadd.xlane.f32.xlu0 %v220_v62 }
 0x12c   :  { %v222_v63 = vpop.xlane.xlu0 %221 }
 0x12d   :  { %v223_v0 = vmul.f32 0.125, %v222_v63 }
 0x12f   :  { %v225_v1 = vsel %vm224_vm4, %v223_v0, -inf }
 0x130   :  { %v226_v2 = vrot.slane %v225_v1, 4 }
 0x132   :  { %v227_v3 = vmax.f32 %v225_v1, %v226_v2 }
 0x134   :  { %v228_v4 = vrot.slane %v227_v3, 2 }
 0x136   :  { %v229_v5 = vmax.f32 %v227_v3, %v228_v4 }
 0x138   :  { %v230_v6 = vrot.slane %v229_v5, 1 }
 0x13a   :  { %v231_v7 = vmax.f32 %v229_v5, %v230_v6 }
 0x13c   :  { %v232_v8 = vsub.f32 %v223_v0, %v231_v7 }
 0x13e   :  { %v233_v9 = vmul.f32 1.442695, %v232_v8 }
 0x140   :  { %271 = vpow2.f32 %v233_v9 }
 0x146   :  { %v272_v10 = vpop.eup %271 }
 0x147   :  { %v235_v11 = vsel %vm224_vm4, %v272_v10, 0.0 }
 0x148   :  { %v236_v12 = vrot.slane %v235_v11, 4 }
 0x14a   :  { %v237_v13 = vadd.f32 %v236_v12, %v235_v11 }
 0x14c   :  { %v238_v14 = vrot.slane %v237_v13, 2 }
 0x14e   :  { %v239_v15 = vadd.f32 %v238_v14, %v237_v13 }
 0x150   :  { %v240_v16 = vrot.slane %v239_v15, 1 }
 0x152   :  { %v241_v17 = vadd.f32 %v240_v16, %v239_v15 }
 0x154   :  { %273 = vrcp.f32 %v241_v17 }
 0x15a   :  { %v274_v18 = vpop.eup %273 }
 0x15b   :  { %v243_v19 = vmul.f32 %v274_v18, %v272_v10 }
 0x15d   :  { %245 = vst.msk [vmem:[%s386_s4] sm:$0xf] %vm244_vm5, %v243_v19 }
 0x15e   :  { %250 = vsyncpa [#allocation4], 1 }
 0x15f   :  { %251 = vsyncpa [#allocation6], 1 }

</bundles_post_ra>
